<compile_context>
chip_gen: v6e
topology: v6e:2x2x1
jax: 0.10.0
libtpu: 0.0.40
codegen_flags: <defaults>
</compile_context>

<pallas_src>
import jax
import jax.numpy as jnp
from jax.experimental import pallas as pl
from jax.experimental.pallas import tpu as pltpu


def _affine_kernel(scale_ref, offset_ref, x_ref, o_ref):
    # scale_ref/offset_ref: (row_tile, 1)   per-row scale / offset
    # x_ref / o_ref:        (row_tile, col_tile)
    x = x_ref[...]
    s = scale_ref[...]          # broadcasts over the lane (spatial) axis
    t = offset_ref[...]
    o_ref[...] = (x * s + t).astype(o_ref.dtype)


def channel_routing_notres(x, prompt, w, b, gamma, beta,
                           *, row_tile=256, col_tile=2048):
    """x: (B, dim, H, W) NCHW, prompt: (B, atom_dim).

    w is the nn.Linear weight pre-transposed to (atom_dim, dim); b is (dim,).
    gamma/beta are the (1, dim, 1, 1) parameters.
    """
    B, dim, H, W = x.shape
    HW = H * W
    rows = B * dim

    # ---- Tiny per-(b, channel) setup work, done outside the kernel ----------
    f32 = jnp.float32
    gate = jax.nn.sigmoid(
        jnp.dot(prompt.astype(f32), w.astype(f32)) + b.astype(f32).reshape(1, dim)
    )                                                     # (B, dim) f32
    gamma_f = gamma.reshape(1, dim).astype(f32)
    beta_f = beta.reshape(1, dim).astype(f32)
    scale = (gamma_f * gate).astype(x.dtype).reshape(rows, 1)   # (B*dim, 1)
    offset = (beta_f * gate).astype(x.dtype).reshape(rows, 1)   # (B*dim, 1)

    # ---- Lane-dense 2-D layout for the big tensor ---------------------------
    x2 = x.reshape(rows, HW)

    # Tile sizes: fixed targets, capped at full extents (full-extent blocks are
    # always legal; fixed tiles are (8,128)-aligned so partial edge blocks are
    # handled by Pallas padding/masking).
    rt = rows if rows <= row_tile else row_tile     # row_tile % 8 == 0
    ct = HW if HW <= col_tile else col_tile         # col_tile % 128 == 0
    grid = (pl.cdiv(rows, rt), pl.cdiv(HW, ct))

    itemsize = jnp.dtype(x.dtype).itemsize
    cost = pl.CostEstimate(
        flops=2 * rows * HW,
        transcendentals=0,
        bytes_accessed=2 * rows * HW * itemsize + 2 * rows * itemsize,
    )

    out2 = pl.pallas_call(
        _affine_kernel,
        out_shape=jax.ShapeDtypeStruct((rows, HW), x.dtype),
        grid_spec=pltpu.PrefetchScalarGridSpec(
            num_scalar_prefetch=0,
            grid=grid,
            in_specs=[
                pl.BlockSpec((rt, 1), lambda ri, ci: (ri, 0)),    # scale
                pl.BlockSpec((rt, 1), lambda ri, ci: (ri, 0)),    # offset
                pl.BlockSpec((rt, ct), lambda ri, ci: (ri, ci)),  # x
            ],
            out_specs=pl.BlockSpec((rt, ct), lambda ri, ci: (ri, ci)),
        ),
        compiler_params=pltpu.CompilerParams(
            dimension_semantics=("parallel", "parallel"),
            vmem_limit_bytes=32 * 1024 * 1024,   # explicit; ~8 MiB actually used
        ),
        cost_estimate=cost,
    )(scale, offset, x2)

    return out2.reshape(B, dim, H, W)


def channel_routing_ref(x, prompt, w, b, gamma, beta):
    """Pure-JAX reference mirroring the PyTorch forward exactly."""
    gate = jax.nn.sigmoid(prompt @ w + b)                 # (B, dim)
    gate = gate[:, :, None, None]
    out = x * gamma.reshape(1, -1, 1, 1) + beta.reshape(1, -1, 1, 1)
    return out * gate


if __name__ == "__main__":
    # Small shapes consistent with the module.
    B, dim, H, W = 2, 4, 16, 16
    atom_dim = 8

    key = jax.random.PRNGKey(0)
    kx, kp, kw, kb, kg, kbeta = jax.random.split(key, 6)

    x = jax.random.normal(kx, (B, dim, H, W), dtype=jnp.float32)
    prompt = jax.random.normal(kp, (B, atom_dim), dtype=jnp.float32)

    # nn.Linear(atom_dim, dim): weight (dim, atom_dim), bias (dim,).
    # Stored here pre-transposed as (atom_dim, dim) so y = prompt @ w + b.
    w = jax.random.normal(kw, (atom_dim, dim), dtype=jnp.float32) * 0.1
    b = jax.random.normal(kb, (dim,), dtype=jnp.float32) * 0.1
    # Module inits gamma/beta to zeros (shape (1, dim, 1, 1)); use deterministic
    # nonzero values here so the elementwise path is actually exercised.
    gamma = jax.random.normal(kg, (1, dim, 1, 1), dtype=jnp.float32)
    beta = jax.random.normal(kbeta, (1, dim, 1, 1), dtype=jnp.float32)

    out = channel_routing_notres(x, prompt, w, b, gamma, beta)
    out = jax.block_until_ready(out)

    ref = channel_routing_ref(x, prompt, w, b, gamma, beta)
    assert out.shape == (B, dim, H, W)
    assert jnp.allclose(out, ref, atol=1e-5, rtol=1e-5)

    print("KERNEL_OK")
</pallas_src>

<mosaic_0001>
module attributes {stable_mosaic.version = 11 : i64} {
  func.func @_affine_kernel(%arg0: i32, %arg1: i32, %arg2: memref<8x1xf32, #tpu.memory_space<vmem>>, %arg3: memref<8x1xf32, #tpu.memory_space<vmem>>, %arg4: memref<8x256xf32, #tpu.memory_space<vmem>>, %arg5: memref<8x256xf32, #tpu.memory_space<vmem>>) attributes {dimension_semantics = [#tpu.dimension_semantics<parallel>, #tpu.dimension_semantics<parallel>], iteration_bounds = array<i64: 1, 1>, scalar_prefetch = 0 : i64, scratch_operands = 0 : i64, tpu.core_type = #tpu.core_type<tc>, window_params = [{transform_indices = @transform_0, window_bounds = array<i64: 8, 1>}, {transform_indices = @transform_1, window_bounds = array<i64: 8, 1>}, {transform_indices = @transform_2, window_bounds = array<i64: 8, 256>}, {transform_indices = @transform_3, window_bounds = array<i64: 8, 256>}]} {
    %c0 = arith.constant 0 : index
    %c0_0 = arith.constant 0 : index
    %0 = vector.load %arg4[%c0, %c0_0] : memref<8x256xf32, #tpu.memory_space<vmem>>, vector<8x256xf32>
    %c0_1 = arith.constant 0 : index
    %c0_2 = arith.constant 0 : index
    %1 = vector.load %arg2[%c0_1, %c0_2] : memref<8x1xf32, #tpu.memory_space<vmem>>, vector<8x1xf32>
    %c0_3 = arith.constant 0 : index
    %c0_4 = arith.constant 0 : index
    %2 = vector.load %arg3[%c0_3, %c0_4] : memref<8x1xf32, #tpu.memory_space<vmem>>, vector<8x1xf32>
    %3 = vector.broadcast %1 : vector<8x1xf32> to vector<8x256xf32>
    %4 = arith.mulf %0, %3 : vector<8x256xf32>
    %5 = vector.broadcast %2 : vector<8x1xf32> to vector<8x256xf32>
    %6 = arith.addf %4, %5 : vector<8x256xf32>
    %c0_5 = arith.constant 0 : index
    %c0_6 = arith.constant 0 : index
    %7 = vector.load %arg5[%c0_5, %c0_6] : memref<8x256xf32, #tpu.memory_space<vmem>>, vector<8x256xf32>
    tpu.vector_store %arg5[%c0_5, %c0_6], %6 {strides = array<i32>} : memref<8x256xf32, #tpu.memory_space<vmem>>, vector<8x256xf32>,
    return
  }
  func.func @transform_0(%arg0: i32, %arg1: i32) -> (i32, i32) {
    %c0_i32 = arith.constant 0 : i32
    %c0_i32_0 = arith.constant 0 : i32
    return %arg0, %c0_i32 : i32, i32
  }
  func.func @transform_1(%arg0: i32, %arg1: i32) -> (i32, i32) {
    %c0_i32 = arith.constant 0 : i32
    %c0_i32_0 = arith.constant 0 : i32
    return %arg0, %c0_i32 : i32, i32
  }
  func.func @transform_2(%arg0: i32, %arg1: i32) -> (i32, i32) {
    %c0_i32 = arith.constant 0 : i32
    return %arg0, %arg1 : i32, i32
  }
  func.func @transform_3(%arg0: i32, %arg1: i32) -> (i32, i32) {
    %c0_i32 = arith.constant 0 : i32
    return %arg0, %arg1 : i32, i32
  }
}

</mosaic_0001>

<bundles_post_ra>
// kernel: tpu_custom_call.1
= control target key start
LH: loop header
LB: loop body
LE: loop exit
PB: predicated region body
PF: predicated region fallthrough
CT: control target
= control target key end

     0   :  { %v74_v1 = vmov 0   ;;  %s111_s0 = inlined_call_operand.vmem [shape: f32[8,1], index: 0, kind: input, shape index: {}]   ;;  %s112_s1 = inlined_call_operand.vmem [shape: f32[8,1], index: 1, kind: input, shape index: {}]   ;;  %s113_s2 = inlined_call_operand.vmem [shape: f32[8,256], index: 2, kind: input, shape index: {}]   ;;  %s114_s3 = inlined_call_operand.hbm [shape: f32[8,256], index: 3, kind: output, shape index: {}]  }
   0x1   :  { %v17_v0 = vld [vmem:[%s111_s0] sm:$0xff]  ;;  %51 = vset.pattern.permute.xlu0 %v74_v1 }
   0x2   :  { %8 = vsyncpa [#allocation3], 0  ;;  %21 = vperm.xlu0 %51, %v17_v0   ;;  %v18_v2 = vld [vmem:[%s112_s1] sm:$0xff]  ;;  %v16_v5 = vld [vmem:[%s113_s2 + $0x8] sm:$0xff]  ;;  %s75_s20 = smov [#allocation2]  }
   0x3   :  { %v15_v4 = vld [vmem:[%s113_s2] sm:$0xff]  ;;  %s41_s0 = sshll.u32 %s75_s20, 4  ;;  %s42_s0 = int_to_ptr.vmem [resolvable:$true] %s41_s0 }
   0x4   :  { %s52_s1 = scalar_lea.vmem %s42_s0, 256  ;;  %p57_p1 = scmp.lt.s32.totalorder %s42_s0, %s42_s0 }
   0x5   :  { %p53_p0 = scmp.ne.s32.totalorder %s42_s0, %s52_s1  ;;  %p58_p2 = scmp.lt.s32.totalorder %s52_s1, %s52_s1 }
   0x6   :  { %28 = vperm.xlu0 %51, %v18_v2  }
   0x7   :  { %p59_p3 = por %p58_p2, %p57_p1 }
   0x9   :  { %p60_p4 = pnand %p59_p3, %p53_p0 }
  0x7d   :  { %v22_v3 = vpop.permute.xlu0 %21 }
  0x7e   :  { %v24_v6 = vmul.f32 %v22_v3, %v15_v4  ;;  %v25_v7 = vmul.f32 %v22_v3, %v16_v5 }
  0x81   :  { %v29_v8 = vpop.permute.xlu0 %28 }
  0x82   :  { %v31_v9 = vadd.f32 %v29_v8, %v24_v6  ;;  %v32_v10 = vadd.f32 %v29_v8, %v25_v7 }
  0x84   :  { %33 = vst [vmem:[#allocation2] sm:$0xff] %v31_v9  ;;  %34 = vst [vmem:[#allocation2 + $0x8] sm:$0xff] %v32_v10 }
  0x85   :  { %63 = shalt.err (!%p60_p4)
}
  0x86   :  { %44 = dma.vmem_to_hbm [thread:$0]  %s42_s0, 256, %s114_s3, [#allocation3]  }
  0x87   :  { %72 = dma.done.wait [#allocation3], 256  }
  0x88   :  { %73 = vsyncadd [#allocation3], 4294967040 }
  0x89   :  { %48 = vsyncpa [#allocation3], 1 }

</bundles_post_ra>
